<compile_context>
chip_gen: v7x
topology: tpu7x:2x2x1
jax: 0.10.0
libtpu: 0.0.40
codegen_flags: <defaults>
</compile_context>

<pallas_src>
import functools

import jax
import jax.numpy as jnp
from jax.experimental import pallas as pl
from jax.experimental.pallas import tpu as pltpu

C_OUT = 48     # conv output channels (fixed by the PyTorch module)
HIDDEN = 256   # Linear1 output features (fixed by the PyTorch module)


def _ceil_to(a: int, b: int) -> int:
    return -(-a // b) * b


def _fused_textcnn_kernel(x_ref, wconv_ref, bconv_ref, w1_ref, b1_ref,
                          w2_ref, b2_ref, out_ref, acc_ref):
    """One (batch_tile, time_tile) grid step of the fused TextCNN forward."""
    j = pl.program_id(1)                 # reduction step over time tiles
    num_j = pl.num_programs(1)

    _, tb, e = x_ref.shape               # x block: (W_total, block_b, E)
    k_taps = wconv_ref.shape[0]          # word_kernel_size
    block_t = w1_ref.shape[0] // C_OUT   # conv time-steps handled this step

    @pl.when(j == 0)
    def _init():
        acc_ref[...] = jnp.zeros_like(acc_ref)

    # ---- Conv1d(+bias)+Tanh for block_t output positions --------------------
    # conv[t*tb + b, c] = sum_k x_words[j*block_t + t + k, b, :] @ wconv[k][:, c]
    base = j * block_t
    conv = jnp.zeros((block_t * tb, C_OUT), jnp.float32)
    for k in range(k_taps):                               # K is small & static
        xs = x_ref[pl.ds(base + k, block_t), :, :]        # (block_t, tb, E)
        conv = conv + jnp.dot(xs.reshape(block_t * tb, e), wconv_ref[k],
                              preferred_element_type=jnp.float32)
    conv = jnp.tanh(conv + bconv_ref[...])                # tanh BEFORE Linear1
    conv = conv.astype(w1_ref.dtype)

    # ---- partial Linear1: contract against the matching (permuted) W1 rows --
    partial = jnp.zeros((tb, HIDDEN), jnp.float32)
    for t in range(block_t):                              # static, unrolled
        a_t = conv[t * tb:(t + 1) * tb, :]                # (tb, 48)
        w_t = w1_ref[t * C_OUT:(t + 1) * C_OUT, :]        # (48, 256)
        partial = partial + jnp.dot(a_t, w_t,
                                    preferred_element_type=jnp.float32)
    acc_ref[...] += partial

    # ---- epilogue: bias + ReLU + Linear2, lane-dense store -------------------
    @pl.when(j == num_j - 1)
    def _epilogue():
        hidden = jnp.maximum(acc_ref[...] + b1_ref[...], 0.0)        # (tb, 256)
        logits = jnp.dot(hidden.astype(w2_ref.dtype), w2_ref[...],
                         preferred_element_type=jnp.float32) + b2_ref[...]
        out_ref[...] = logits.astype(out_ref.dtype)


def textcnn_forward(x, params, *, word_embd_dim, word_kernel_size=2,
                    block_b=8, block_t=8, w1_stream_dtype=None):
    """Fused TextCNN forward.  x: (B, 1, num_words * word_embd_dim) float32."""
    E, K = word_embd_dim, word_kernel_size
    assert block_b % 8 == 0 and block_t >= 1

    conv_w, conv_b = params["conv_w"], params["conv_b"]
    w1, b1 = params["w1"], params["b1"]
    w2, b2 = params["w2"], params["b2"]

    B, cin, L = x.shape
    assert cin == 1 and L % E == 0
    num_words = L // E
    t_out = num_words + K - 1                  # Conv1d output length
    num_classes = w2.shape[0]
    assert w1.shape == (HIDDEN, C_OUT * t_out), w1.shape

    # ------- one-time (load/trace-time) weight re-layouts ---------------------
    # Conv taps: (48, 1, K*E) -> (K, E, 48) so each tap is an (E, 48) matmul.
    wconv = conv_w.reshape(C_OUT, K, E).transpose(1, 2, 0)
    # Permute W1 from PyTorch's channel-major flatten (c*T_out + t) to the
    # kernel's natural time-major (t*48 + c) ordering.
    w1p = (w1.reshape(HIDDEN, C_OUT, t_out)
             .transpose(2, 1, 0)
             .reshape(t_out * C_OUT, HIDDEN))
    if w1_stream_dtype is not None:            # e.g. jnp.bfloat16 on v5e
        w1p = w1p.astype(w1_stream_dtype)

    # ------- pad to tile-friendly sizes ----------------------------------------
    t_pad = _ceil_to(t_out, block_t)
    b_pad = _ceil_to(B, block_b)
    c_pad = max(128, _ceil_to(num_classes, 128))   # lane-dense logits block
    w_total = t_pad + K - 1                        # words incl. conv zero-pad

    w1p = jnp.pad(w1p, ((0, (t_pad - t_out) * C_OUT), (0, 0)))  # zero rows -> no-op
    w2t = jnp.pad(w2.T, ((0, 0), (0, c_pad - num_classes)))
    b2p = jnp.pad(b2, (0, c_pad - num_classes)).reshape(1, c_pad)
    bconv = conv_b.reshape(1, C_OUT)
    b1p = b1.reshape(1, HIDDEN)

    # Signal -> zero-padded word view stored (word, batch, E) so the kernel's
    # shifted conv windows are cheap leading-dim dynamic slices (no im2col).
    x_sig = jnp.pad(x[:, 0, :], ((0, b_pad - B),
                                 ((K - 1) * E, (t_pad - num_words) * E)))
    x_words = x_sig.reshape(b_pad, w_total, E).transpose(1, 0, 2)

    grid = (b_pad // block_b, t_pad // block_t)

    in_specs = [
        pl.BlockSpec((w_total, block_b, E), lambda i, j: (0, i, 0)),   # signal, resident
        pl.BlockSpec((K, E, C_OUT), lambda i, j: (0, 0, 0)),           # conv taps
        pl.BlockSpec((1, C_OUT), lambda i, j: (0, 0)),                 # conv bias
        pl.BlockSpec((block_t * C_OUT, HIDDEN), lambda i, j: (j, 0)),  # W1, streamed over j
        pl.BlockSpec((1, HIDDEN), lambda i, j: (0, 0)),                # b1
        pl.BlockSpec((HIDDEN, c_pad), lambda i, j: (0, 0)),            # W2, resident
        pl.BlockSpec((1, c_pad), lambda i, j: (0, 0)),                 # b2
    ]
    out_specs = pl.BlockSpec((block_b, c_pad), lambda i, j: (i, 0))

    def _nbytes(a):
        return a.size * a.dtype.itemsize

    flops = (2 * b_pad * t_pad * K * E * C_OUT        # conv
             + 2 * b_pad * t_pad * C_OUT * HIDDEN     # Linear1
             + 2 * b_pad * HIDDEN * c_pad)            # Linear2
    cost = pl.CostEstimate(
        flops=int(flops),
        transcendentals=int(b_pad * t_pad * C_OUT),   # tanh
        bytes_accessed=int(sum(_nbytes(a) for a in
                               (x_words, wconv, bconv, w1p, b1p, w2t, b2p))
                           + b_pad * c_pad * 4))

    out = pl.pallas_call(
        _fused_textcnn_kernel,
        out_shape=jax.ShapeDtypeStruct((b_pad, c_pad), jnp.float32),
        grid_spec=pltpu.PrefetchScalarGridSpec(
            num_scalar_prefetch=0,
            grid=grid,
            in_specs=in_specs,
            out_specs=out_specs,
            scratch_shapes=[pltpu.VMEM((block_b, HIDDEN), jnp.float32)],
        ),
        compiler_params=pltpu.CompilerParams(
            # Batch tiles may be sharded across TensorCores (v7x); the
            # time/Linear1 reduction axis is sequential.
            dimension_semantics=("parallel", "arbitrary"),
            # Safe on v5e/v6e (128 MiB) and v7x (64 MiB); raise toward ~100 MiB
            # together with a larger block_t on v5e/v6e for full-size W1.
            vmem_limit_bytes=48 * 1024 * 1024,
        ),
        cost_estimate=cost,
    )(x_words, wconv, bconv, w1p, b1p, w2t, b2p)

    return out[:B, :num_classes]


def reference_forward(x, params, *, word_embd_dim, word_kernel_size=2):
    """Plain-JAX mirror of the PyTorch module (for correctness checking)."""
    E, K = word_embd_dim, word_kernel_size
    conv = jax.lax.conv_general_dilated(
        x, params["conv_w"],
        window_strides=(E,),
        padding=[((K - 1) * E, (K - 1) * E)],
        dimension_numbers=("NCH", "OIH", "NCH"))
    conv = conv + params["conv_b"][None, :, None]
    act = jnp.tanh(conv)                          # (B, 48, T_out)
    flat = act.reshape(act.shape[0], -1)          # PyTorch channel-major flatten
    hidden = jnp.maximum(flat @ params["w1"].T + params["b1"], 0.0)
    return hidden @ params["w2"].T + params["b2"]


if __name__ == "__main__":
    # Small synthetic shapes consistent with the module.
    E = 16                 # word_embd_dim
    K = 2                  # word_kernel_size
    num_words = 37
    B = 12
    num_classes = 10
    L = num_words * E
    t_out = num_words + K - 1
    in_features = C_OUT * t_out     # 48 * T_out (63408 in the original model)

    key = jax.random.PRNGKey(0)
    ks = jax.random.split(key, 7)
    x = jax.random.normal(ks[0], (B, 1, L), jnp.float32)
    params = {
        "conv_w": 0.3 * jax.random.normal(ks[1], (C_OUT, 1, K * E), jnp.float32),
        "conv_b": 0.1 * jax.random.normal(ks[2], (C_OUT,), jnp.float32),
        "w1": jax.random.normal(ks[3], (HIDDEN, in_features), jnp.float32)
              / jnp.sqrt(float(in_features)),
        "b1": 0.05 * jax.random.normal(ks[4], (HIDDEN,), jnp.float32),
        "w2": jax.random.normal(ks[5], (num_classes, HIDDEN), jnp.float32)
              / jnp.sqrt(float(HIDDEN)),
        "b2": 0.05 * jax.random.normal(ks[6], (num_classes,), jnp.float32),
    }

    fwd = jax.jit(functools.partial(
        textcnn_forward, word_embd_dim=E, word_kernel_size=K,
        block_b=8, block_t=8))          # block_t can be raised for real shapes
    out = jax.block_until_ready(fwd(x, params))
    assert out.shape == (B, num_classes)

    ref = reference_forward(x, params, word_embd_dim=E, word_kernel_size=K)
    max_err = float(jnp.max(jnp.abs(out - ref)))
    assert max_err < 5e-2, f"max abs error vs reference: {max_err}"

    print("KERNEL_OK")
</pallas_src>

<mosaic_0001>
module attributes {stable_mosaic.version = 11 : i64} {
  func.func @_fused_textcnn_kernel(%arg0: i32, %arg1: i32, %arg2: memref<41x8x16xf32, #tpu.memory_space<vmem>>, %arg3: memref<2x16x48xf32, #tpu.memory_space<vmem>>, %arg4: memref<1x48xf32, #tpu.memory_space<vmem>>, %arg5: memref<384x256xf32, #tpu.memory_space<vmem>>, %arg6: memref<1x256xf32, #tpu.memory_space<vmem>>, %arg7: memref<256x128xf32, #tpu.memory_space<vmem>>, %arg8: memref<1x128xf32, #tpu.memory_space<vmem>>, %arg9: memref<8x128xf32, #tpu.memory_space<vmem>>, %arg10: memref<8x256xf32, #tpu.memory_space<vmem>>) attributes {dimension_semantics = [#tpu.dimension_semantics<parallel>, #tpu.dimension_semantics<arbitrary>], iteration_bounds = array<i64: 2, 5>, scalar_prefetch = 0 : i64, scratch_operands = 1 : i64, tpu.core_type = #tpu.core_type<tc>, window_params = [{transform_indices = @transform_0, window_bounds = array<i64: 41, 8, 16>}, {pipeline_mode = #tpu.pipeline_mode<synchronous>, transform_indices = @transform_1, window_bounds = array<i64: 2, 16, 48>}, {pipeline_mode = #tpu.pipeline_mode<synchronous>, transform_indices = @transform_2, window_bounds = array<i64: 1, 48>}, {transform_indices = @transform_3, window_bounds = array<i64: 384, 256>}, {pipeline_mode = #tpu.pipeline_mode<synchronous>, transform_indices = @transform_4, window_bounds = array<i64: 1, 256>}, {pipeline_mode = #tpu.pipeline_mode<synchronous>, transform_indices = @transform_5, window_bounds = array<i64: 256, 128>}, {pipeline_mode = #tpu.pipeline_mode<synchronous>, transform_indices = @transform_6, window_bounds = array<i64: 1, 128>}, {transform_indices = @transform_7, window_bounds = array<i64: 8, 128>}]} {
    %c0_i32 = arith.constant 0 : i32
    %0 = arith.cmpi eq, %arg1, %c0_i32 : i32
    %1 = arith.extui %0 : i1 to i32
    %c0_i32_0 = arith.constant 0 : i32
    %2 = arith.cmpi ne, %1, %c0_i32_0 : i32
    scf.if %2 {
      %cst_37 = arith.constant 0.000000e+00 : f32
      %64 = vector.broadcast %cst_37 : f32 to vector<8x256xf32>
      %c0_38 = arith.constant 0 : index
      %c0_39 = arith.constant 0 : index
      %65 = vector.load %arg10[%c0_38, %c0_39] : memref<8x256xf32, #tpu.memory_space<vmem>>, vector<8x256xf32>
      tpu.vector_store %arg10[%c0_38, %c0_39], %64 {strides = array<i32>} : memref<8x256xf32, #tpu.memory_space<vmem>>, vector<8x256xf32>,
    } else {
    }
    %c8_i32 = arith.constant 8 : i32
    %3 = arith.muli %arg1, %c8_i32 : i32
    %cst = arith.constant 0.000000e+00 : f32
    %4 = vector.broadcast %cst : f32 to vector<64x48xf32>
    %c0_i32_1 = arith.constant 0 : i32
    %5 = arith.addi %3, %c0_i32_1 : i32
    %6 = arith.index_cast %5 : i32 to index
    %c0 = arith.constant 0 : index
    %c0_2 = arith.constant 0 : index
    %7 = vector.load %arg2[%6, %c0, %c0_2] : memref<41x8x16xf32, #tpu.memory_space<vmem>>, vector<8x8x16xf32>
    %8 = vector.shape_cast %7 : vector<8x8x16xf32> to vector<64x16xf32>
    %c0_3 = arith.constant 0 : index
    %c0_4 = arith.constant 0 : index
    %c0_5 = arith.constant 0 : index
    %9 = vector.load %arg3[%c0_3, %c0_4, %c0_5] : memref<2x16x48xf32, #tpu.memory_space<vmem>>, vector<1x16x48xf32>
    %10 = vector.shape_cast %9 : vector<1x16x48xf32> to vector<16x48xf32>
    %cst_6 = arith.constant dense<0.000000e+00> : vector<64x48xf32>
    %11 = tpu.matmul %8, %10, %cst_6 {dimension_numbers = #tpu.dot_dimension_numbers<[1], [0], [0], [1], [0, 0, 1, 1], [], []>} : vector<64x16xf32>, vector<16x48xf32>, vector<64x48xf32> -> vector<64x48xf32>
    %12 = arith.addf %4, %11 : vector<64x48xf32>
    %c1_i32 = arith.constant 1 : i32
    %13 = arith.addi %3, %c1_i32 : i32
    %14 = arith.index_cast %13 : i32 to index
    %c0_7 = arith.constant 0 : index
    %c0_8 = arith.constant 0 : index
    %15 = vector.load %arg2[%14, %c0_7, %c0_8] : memref<41x8x16xf32, #tpu.memory_space<vmem>>, vector<8x8x16xf32>
    %16 = vector.shape_cast %15 : vector<8x8x16xf32> to vector<64x16xf32>
    %c1 = arith.constant 1 : index
    %c0_9 = arith.constant 0 : index
    %c0_10 = arith.constant 0 : index
    %17 = vector.load %arg3[%c1, %c0_9, %c0_10] : memref<2x16x48xf32, #tpu.memory_space<vmem>>, vector<1x16x48xf32>
    %18 = vector.shape_cast %17 : vector<1x16x48xf32> to vector<16x48xf32>
    %cst_11 = arith.constant dense<0.000000e+00> : vector<64x48xf32>
    %19 = tpu.matmul %16, %18, %cst_11 {dimension_numbers = #tpu.dot_dimension_numbers<[1], [0], [0], [1], [0, 0, 1, 1], [], []>} : vector<64x16xf32>, vector<16x48xf32>, vector<64x48xf32> -> vector<64x48xf32>
    %20 = arith.addf %12, %19 : vector<64x48xf32>
    %c0_12 = arith.constant 0 : index
    %c0_13 = arith.constant 0 : index
    %21 = vector.load %arg4[%c0_12, %c0_13] : memref<1x48xf32, #tpu.memory_space<vmem>>, vector<1x48xf32>
    %22 = vector.broadcast %21 : vector<1x48xf32> to vector<64x48xf32>
    %23 = arith.addf %20, %22 : vector<64x48xf32>
    %24 = math.tanh %23 : vector<64x48xf32>
    %cst_14 = arith.constant 0.000000e+00 : f32
    %25 = vector.broadcast %cst_14 : f32 to vector<8x256xf32>
    %26 = vector.extract_strided_slice %24 {offsets = [0, 0], sizes = [8, 48], strides = [1, 1]} : vector<64x48xf32> to vector<8x48xf32>
    %c0_15 = arith.constant 0 : index
    %c0_16 = arith.constant 0 : index
    %27 = vector.load %arg5[%c0_15, %c0_16] : memref<384x256xf32, #tpu.memory_space<vmem>>, vector<48x256xf32>
    %cst_17 = arith.constant dense<0.000000e+00> : vector<8x256xf32>
    %28 = tpu.matmul %26, %27, %cst_17 {dimension_numbers = #tpu.dot_dimension_numbers<[1], [0], [0], [1], [0, 0, 1, 1], [], []>} : vector<8x48xf32>, vector<48x256xf32>, vector<8x256xf32> -> vector<8x256xf32>
    %29 = arith.addf %25, %28 : vector<8x256xf32>
    %30 = vector.extract_strided_slice %24 {offsets = [8, 0], sizes = [8, 48], strides = [1, 1]} : vector<64x48xf32> to vector<8x48xf32>
    %c48 = arith.constant 48 : index
    %c0_18 = arith.constant 0 : index
    %31 = vector.load %arg5[%c48, %c0_18] : memref<384x256xf32, #tpu.memory_space<vmem>>, vector<48x256xf32>
    %cst_19 = arith.constant dense<0.000000e+00> : vector<8x256xf32>
    %32 = tpu.matmul %30, %31, %cst_19 {dimension_numbers = #tpu.dot_dimension_numbers<[1], [0], [0], [1], [0, 0, 1, 1], [], []>} : vector<8x48xf32>, vector<48x256xf32>, vector<8x256xf32> -> vector<8x256xf32>
    %33 = arith.addf %29, %32 : vector<8x256xf32>
    %34 = vector.extract_strided_slice %24 {offsets = [16, 0], sizes = [8, 48], strides = [1, 1]} : vector<64x48xf32> to vector<8x48xf32>
    %c96 = arith.constant 96 : index
    %c0_20 = arith.constant 0 : index
    %35 = vector.load %arg5[%c96, %c0_20] : memref<384x256xf32, #tpu.memory_space<vmem>>, vector<48x256xf32>
    %cst_21 = arith.constant dense<0.000000e+00> : vector<8x256xf32>
    %36 = tpu.matmul %34, %35, %cst_21 {dimension_numbers = #tpu.dot_dimension_numbers<[1], [0], [0], [1], [0, 0, 1, 1], [], []>} : vector<8x48xf32>, vector<48x256xf32>, vector<8x256xf32> -> vector<8x256xf32>
    %37 = arith.addf %33, %36 : vector<8x256xf32>
    %38 = vector.extract_strided_slice %24 {offsets = [24, 0], sizes = [8, 48], strides = [1, 1]} : vector<64x48xf32> to vector<8x48xf32>
    %c144 = arith.constant 144 : index
    %c0_22 = arith.constant 0 : index
    %39 = vector.load %arg5[%c144, %c0_22] : memref<384x256xf32, #tpu.memory_space<vmem>>, vector<48x256xf32>
    %cst_23 = arith.constant dense<0.000000e+00> : vector<8x256xf32>
    %40 = tpu.matmul %38, %39, %cst_23 {dimension_numbers = #tpu.dot_dimension_numbers<[1], [0], [0], [1], [0, 0, 1, 1], [], []>} : vector<8x48xf32>, vector<48x256xf32>, vector<8x256xf32> -> vector<8x256xf32>
    %41 = arith.addf %37, %40 : vector<8x256xf32>
    %42 = vector.extract_strided_slice %24 {offsets = [32, 0], sizes = [8, 48], strides = [1, 1]} : vector<64x48xf32> to vector<8x48xf32>
    %c192 = arith.constant 192 : index
    %c0_24 = arith.constant 0 : index
    %43 = vector.load %arg5[%c192, %c0_24] : memref<384x256xf32, #tpu.memory_space<vmem>>, vector<48x256xf32>
    %cst_25 = arith.constant dense<0.000000e+00> : vector<8x256xf32>
    %44 = tpu.matmul %42, %43, %cst_25 {dimension_numbers = #tpu.dot_dimension_numbers<[1], [0], [0], [1], [0, 0, 1, 1], [], []>} : vector<8x48xf32>, vector<48x256xf32>, vector<8x256xf32> -> vector<8x256xf32>
    %45 = arith.addf %41, %44 : vector<8x256xf32>
    %46 = vector.extract_strided_slice %24 {offsets = [40, 0], sizes = [8, 48], strides = [1, 1]} : vector<64x48xf32> to vector<8x48xf32>
    %c240 = arith.constant 240 : index
    %c0_26 = arith.constant 0 : index
    %47 = vector.load %arg5[%c240, %c0_26] : memref<384x256xf32, #tpu.memory_space<vmem>>, vector<48x256xf32>
    %cst_27 = arith.constant dense<0.000000e+00> : vector<8x256xf32>
    %48 = tpu.matmul %46, %47, %cst_27 {dimension_numbers = #tpu.dot_dimension_numbers<[1], [0], [0], [1], [0, 0, 1, 1], [], []>} : vector<8x48xf32>, vector<48x256xf32>, vector<8x256xf32> -> vector<8x256xf32>
    %49 = arith.addf %45, %48 : vector<8x256xf32>
    %50 = vector.extract_strided_slice %24 {offsets = [48, 0], sizes = [8, 48], strides = [1, 1]} : vector<64x48xf32> to vector<8x48xf32>
    %c288 = arith.constant 288 : index
    %c0_28 = arith.constant 0 : index
    %51 = vector.load %arg5[%c288, %c0_28] : memref<384x256xf32, #tpu.memory_space<vmem>>, vector<48x256xf32>
    %cst_29 = arith.constant dense<0.000000e+00> : vector<8x256xf32>
    %52 = tpu.matmul %50, %51, %cst_29 {dimension_numbers = #tpu.dot_dimension_numbers<[1], [0], [0], [1], [0, 0, 1, 1], [], []>} : vector<8x48xf32>, vector<48x256xf32>, vector<8x256xf32> -> vector<8x256xf32>
    %53 = arith.addf %49, %52 : vector<8x256xf32>
    %54 = vector.extract_strided_slice %24 {offsets = [56, 0], sizes = [8, 48], strides = [1, 1]} : vector<64x48xf32> to vector<8x48xf32>
    %c336 = arith.constant 336 : index
    %c0_30 = arith.constant 0 : index
    %55 = vector.load %arg5[%c336, %c0_30] : memref<384x256xf32, #tpu.memory_space<vmem>>, vector<48x256xf32>
    %cst_31 = arith.constant dense<0.000000e+00> : vector<8x256xf32>
    %56 = tpu.matmul %54, %55, %cst_31 {dimension_numbers = #tpu.dot_dimension_numbers<[1], [0], [0], [1], [0, 0, 1, 1], [], []>} : vector<8x48xf32>, vector<48x256xf32>, vector<8x256xf32> -> vector<8x256xf32>
    %57 = arith.addf %53, %56 : vector<8x256xf32>
    %c0_32 = arith.constant 0 : index
    %c0_33 = arith.constant 0 : index
    %58 = vector.load %arg10[%c0_32, %c0_33] : memref<8x256xf32, #tpu.memory_space<vmem>>, vector<8x256xf32>
    %59 = arith.addf %58, %57 : vector<8x256xf32>
    %c0_34 = arith.constant 0 : index
    %c0_35 = arith.constant 0 : index
    %60 = vector.load %arg10[%c0_34, %c0_35] : memref<8x256xf32, #tpu.memory_space<vmem>>, vector<8x256xf32>
    tpu.vector_store %arg10[%c0_34, %c0_35], %59 {strides = array<i32>} : memref<8x256xf32, #tpu.memory_space<vmem>>, vector<8x256xf32>,
    %c4_i32 = arith.constant 4 : i32
    %61 = arith.cmpi eq, %arg1, %c4_i32 : i32
    %62 = arith.extui %61 : i1 to i32
    %c0_i32_36 = arith.constant 0 : i32
    %63 = arith.cmpi ne, %62, %c0_i32_36 : i32
    scf.if %63 {
      %c0_37 = arith.constant 0 : index
      %c0_38 = arith.constant 0 : index
      %64 = vector.load %arg10[%c0_37, %c0_38] : memref<8x256xf32, #tpu.memory_space<vmem>>, vector<8x256xf32>
      %c0_39 = arith.constant 0 : index
      %c0_40 = arith.constant 0 : index
      %65 = vector.load %arg6[%c0_39, %c0_40] : memref<1x256xf32, #tpu.memory_space<vmem>>, vector<1x256xf32>
      %66 = vector.broadcast %65 : vector<1x256xf32> to vector<8x256xf32>
      %67 = arith.addf %64, %66 : vector<8x256xf32>
      %cst_41 = arith.constant 0.000000e+00 : f32
      %68 = vector.broadcast %cst_41 : f32 to vector<8x256xf32>
      %69 = arith.maximumf %67, %68 : vector<8x256xf32>
      %c0_42 = arith.constant 0 : index
      %c0_43 = arith.constant 0 : index
      %70 = vector.load %arg7[%c0_42, %c0_43] : memref<256x128xf32, #tpu.memory_space<vmem>>, vector<256x128xf32>
      %cst_44 = arith.constant dense<0.000000e+00> : vector<8x128xf32>
      %71 = tpu.matmul %69, %70, %cst_44 {dimension_numbers = #tpu.dot_dimension_numbers<[1], [0], [0], [1], [0, 0, 1, 1], [], []>} : vector<8x256xf32>, vector<256x128xf32>, vector<8x128xf32> -> vector<8x128xf32>
      %c0_45 = arith.constant 0 : index
      %c0_46 = arith.constant 0 : index
      %72 = vector.load %arg8[%c0_45, %c0_46] : memref<1x128xf32, #tpu.memory_space<vmem>>, vector<1x128xf32>
      %73 = vector.broadcast %72 : vector<1x128xf32> to vector<8x128xf32>
      %74 = arith.addf %71, %73 : vector<8x128xf32>
      %c0_47 = arith.constant 0 : index
      %c0_48 = arith.constant 0 : index
      %75 = vector.load %arg9[%c0_47, %c0_48] : memref<8x128xf32, #tpu.memory_space<vmem>>, vector<8x128xf32>
      tpu.vector_store %arg9[%c0_47, %c0_48], %74 {strides = array<i32>} : memref<8x128xf32, #tpu.memory_space<vmem>>, vector<8x128xf32>,
    } else {
    }
    return
  }
  func.func @transform_0(%arg0: i32, %arg1: i32) -> (i32, i32, i32) {
    %c0_i32 = arith.constant 0 : i32
    %c0_i32_0 = arith.constant 0 : i32
    %c0_i32_1 = arith.constant 0 : i32
    return %c0_i32, %arg0, %c0_i32_0 : i32, i32, i32
  }
  func.func @transform_1(%arg0: i32, %arg1: i32) -> (i32, i32, i32) {
    %c0_i32 = arith.constant 0 : i32
    %c0_i32_0 = arith.constant 0 : i32
    %c0_i32_1 = arith.constant 0 : i32
    %c0_i32_2 = arith.constant 0 : i32
    return %c0_i32, %c0_i32_0, %c0_i32_1 : i32, i32, i32
  }
  func.func @transform_2(%arg0: i32, %arg1: i32) -> (i32, i32) {
    %c0_i32 = arith.constant 0 : i32
    %c0_i32_0 = arith.constant 0 : i32
    %c0_i32_1 = arith.constant 0 : i32
    return %c0_i32, %c0_i32_0 : i32, i32
  }
  func.func @transform_3(%arg0: i32, %arg1: i32) -> (i32, i32) {
    %c0_i32 = arith.constant 0 : i32
    %c0_i32_0 = arith.constant 0 : i32
    return %arg1, %c0_i32 : i32, i32
  }
  func.func @transform_4(%arg0: i32, %arg1: i32) -> (i32, i32) {
    %c0_i32 = arith.constant 0 : i32
    %c0_i32_0 = arith.constant 0 : i32
    %c0_i32_1 = arith.constant 0 : i32
    return %c0_i32, %c0_i32_0 : i32, i32
  }
  func.func @transform_5(%arg0: i32, %arg1: i32) -> (i32, i32) {
    %c0_i32 = arith.constant 0 : i32
    %c0_i32_0 = arith.constant 0 : i32
    %c0_i32_1 = arith.constant 0 : i32
    return %c0_i32, %c0_i32_0 : i32, i32
  }
  func.func @transform_6(%arg0: i32, %arg1: i32) -> (i32, i32) {
    %c0_i32 = arith.constant 0 : i32
    %c0_i32_0 = arith.constant 0 : i32
    %c0_i32_1 = arith.constant 0 : i32
    return %c0_i32, %c0_i32_0 : i32, i32
  }
  func.func @transform_7(%arg0: i32, %arg1: i32) -> (i32, i32) {
    %c0_i32 = arith.constant 0 : i32
    %c0_i32_0 = arith.constant 0 : i32
    return %arg0, %c0_i32 : i32, i32
  }
}

</mosaic_0001>

<bundles_post_ra>
// kernel: textcnn_forward.1
= control target key start
LH: loop header
LB: loop body
LE: loop exit
PB: predicated region body
PF: predicated region fallthrough
CT: control target
= control target key end

     0   :  { %s2805_s0 = inlined_call_operand.vmem [shape: f32[41,16,16], index: 0, kind: input, shape index: {}]   ;;  %s2806_s1 = inlined_call_operand.vmem [shape: f32[2,16,48], index: 1, kind: input, shape index: {}]   ;;  %s2807_s2 = inlined_call_operand.vmem [shape: f32[1,48], index: 2, kind: input, shape index: {}]   ;;  %s2808_s3 = inlined_call_operand.vmem [shape: f32[1920,256], index: 3, kind: input, shape index: {}]   ;;  %s2809_s4 = inlined_call_operand.vmem [shape: f32[1,256], index: 4, kind: input, shape index: {}]   ;;  %s2810_s5 = inlined_call_operand.vmem [shape: f32[256,128], index: 5, kind: input, shape index: {}]   ;;  %s2811_s6 = inlined_call_operand.vmem [shape: f32[1,128], index: 6, kind: input, shape index: {}]   ;;  %s2812_s7 = inlined_call_operand.hbm [shape: f32[16,128], index: 7, kind: output, shape index: {}]  }
   0x1   :  { %2814 = sst [smem:[#allocation9_spill]] %s2805_s0 }
   0x2   :  { %2815 = sst [smem:[#allocation10_spill]] %s2808_s3 }
   0x3   :  { %12 = vsyncpa [#allocation5], 0 }
   0x4   :  { %14 = vsyncpa [#allocation5 + $0x1], 0  ;;  %s2303_s24 = smov 0   ;;  %s2305_s25 = smov 0  }
   0x5   :  { %s2307_s26 = smov 0   ;;  %s2309_s27 = smov 0  }
   0x6   :  { %s2311_s28 = smov 0   ;;  %s2313_s29 = smov 0  }
   0x7   :  { %s2315_s30 = smov 0   ;;  %s2317_s8 = smov 0  }
   0x8 LB: > { %s1770_s9 = sadd.s32 4294967295, %s2258_s8   ;;  %s1771_s10 = sadd.s32 4294967294, %s2258_s8   ;;  %s2258_s8 = sphi %s2317_s8, %s20_s8   ;;  %s2254_s30 = sphi %s2315_s30, %s2831_s30   ;;  %s2250_s29 = sphi %s2313_s29, %s2830_s29   ;;  %s2246_s28 = sphi %s2311_s28, %s2829_s28   ;;  %s2242_s27 = sphi %s2309_s27, %s2828_s27   ;;  %s2238_s26 = sphi %s2307_s26, %s2827_s26   ;;  %s2234_s25 = sphi %s2305_s25, %s2826_s25   ;;  %s2230_s24 = sphi %s2303_s24, %s2825_s24  }
   0x9   : > { %s29_s11 = sadd.s32 1, %s2250_s29  ;;  %s32_s12 = sadd.s32 1, %s2254_s30 }
   0xa   : > { %p30_p0 = scmp.ge.s32.totalorder %s29_s11, 5  ;;  %p46_p1 = scmp.ne.s32.totalorder %s2238_s26, %s2234_s25 }
   0xb   : > { %p47_p2 = scmp.eq.s32.totalorder %s2258_s8, 0  ;;  %p207_p4 = scmp.eq.s32.totalorder %s1770_s9, 9 }
   0xc   : > { %s2833_s11 = smov (%p30_p0, %s29_s11), 0  ;;  %s2835_s12 = smov (!%p30_p0, %s32_s12), %s2254_s30 }
   0xd   : > { %2816 = sst [smem:[#allocation7_spill]] %s2833_s11  ;;  %p2353_p3 = por %p47_p2, %p46_p1 }
   0xe   : > { %p34_p5 = scmp.ge.s32.totalorder %s2835_s12, 2  ;;  %p212_p6 = scmp.ne.s32.totalorder %s2234_s25, %s2230_s24 }
   0xf   : > { %p2359_p7 = por %p207_p4, %p46_p1  ;;  %p213_p8 = scmp.eq.s32.totalorder %s1771_s10, 9 }
  0x10   : > { %s2837_s12 = smov (%p34_p5, %s2835_s12), 0  ;;  %s39_s17 = sadd.s32 1, %s2238_s26 }
  0x11   : > { %2819 = sst [smem:[#allocation8_spill]] %s2837_s12  ;;  %p2365_p9 = por %p213_p8, %p212_p6 }
  0x12   : > { %s36_s16 = ssub.s32 %s2254_s30, %s2837_s12  ;;  %p1773_p11 = scmp.ge.s32.totalorder %s2258_s8, 10 }
  0x13   : > { %p37_p10 = scmp.eq.s32.totalorder %s36_s16, 0 }
  0x14   : > { %244 = sbr.rel (%p1773_p11) target bundleno = 58 (0x3a), region = 36 }
  0x15   : > { %s2373_s18 = scalar_select %p37_p10, %s2238_s26, %s39_s17  }
  0x1b   : > { %247 = sbr.rel (!%p2353_p3) target bundleno = 58 (0x3a), region = 40  ;;  %s249_s19 = sand.u32 (%p2353_p3), 1, %s2238_s26  }
  0x1c   : > { %s1774_s20 = sshll.u32 (%p2353_p3), %s2254_s30, 3  ;;  %s2073_s21 = smul.u32 (%p2353_p3), 328, %s249_s19 }
  0x1d   : > { %s2821_s0 = sld [smem:[#allocation9_spill]] (%p2353_p3) }
  0x1e   : > { %s2391_s10 = scalar_lea.vmem (%p2353_p3), [#allocation3], %s2073_s21 }
  0x23   : > { %s2383_s9 = scalar_lea.vmem %s2821_s0, %s1774_s20 }
  0x24   : > { %v361_v0 = vld [vmem:[%s2383_s9] sm:$0xff]  ;;  %v363_v1 = vld [vmem:[%s2383_s9 + $0x10] sm:$0xff] }
  0x25   : > { %v365_v2 = vld [vmem:[%s2383_s9 + $0x20] sm:$0xff]  ;;  %v367_v3 = vld [vmem:[%s2383_s9 + $0x30] sm:$0xff]  ;;  %362 = vst [vmem:[%s2391_s10] sm:$0xff] %v361_v0  ;;  %364 = vst [vmem:[%s2391_s10 + $0x8] sm:$0xff] %v363_v1 }
  0x26   : > { %v369_v4 = vld [vmem:[%s2383_s9 + $0x40] sm:$0xff]  ;;  %v371_v5 = vld [vmem:[%s2383_s9 + $0x50] sm:$0xff]  ;;  %366 = vst [vmem:[%s2391_s10 + $0x10] sm:$0xff] %v365_v2  ;;  %368 = vst [vmem:[%s2391_s10 + $0x18] sm:$0xff] %v367_v3 }
  0x27   : > { %370 = vst [vmem:[%s2391_s10 + $0x20] sm:$0xff] %v369_v4  ;;  %372 = vst [vmem:[%s2391_s10 + $0x28] sm:$0xff] %v371_v5  ;;  %v373_v6 = vld [vmem:[%s2383_s9 + $0x60] sm:$0xff]  ;;  %v375_v7 = vld [vmem:[%s2383_s9 + $0x70] sm:$0xff] }
  0x28   : > { %v377_v8 = vld [vmem:[%s2383_s9 + $0x80] sm:$0xff]  ;;  %374 = vst [vmem:[%s2391_s10 + $0x30] sm:$0xff] %v373_v6  ;;  %376 = vst [vmem:[%s2391_s10 + $0x38] sm:$0xff] %v375_v7  ;;  %v379_v9 = vld [vmem:[%s2383_s9 + $0x90] sm:$0xff] }
  0x29   : > { %378 = vst [vmem:[%s2391_s10 + $0x40] sm:$0xff] %v377_v8  ;;  %v381_v10 = vld [vmem:[%s2383_s9 + $0xa0] sm:$0xff]  ;;  %v383_v11 = vld [vmem:[%s2383_s9 + $0xb0] sm:$0xff]  ;;  %380 = vst [vmem:[%s2391_s10 + $0x48] sm:$0xff] %v379_v9 }
  0x2a   : > { %382 = vst [vmem:[%s2391_s10 + $0x50] sm:$0xff] %v381_v10  ;;  %384 = vst [vmem:[%s2391_s10 + $0x58] sm:$0xff] %v383_v11  ;;  %v385_v12 = vld [vmem:[%s2383_s9 + $0xc0] sm:$0xff]  ;;  %v387_v13 = vld [vmem:[%s2383_s9 + $0xd0] sm:$0xff] }
  0x2b   : > { %v389_v14 = vld [vmem:[%s2383_s9 + $0xe0] sm:$0xff]  ;;  %386 = vst [vmem:[%s2391_s10 + $0x60] sm:$0xff] %v385_v12  ;;  %388 = vst [vmem:[%s2391_s10 + $0x68] sm:$0xff] %v387_v13  ;;  %v391_v15 = vld [vmem:[%s2383_s9 + $0xf0] sm:$0xff] }
  0x2c   : > { %390 = vst [vmem:[%s2391_s10 + $0x70] sm:$0xff] %v389_v14  ;;  %v393_v16 = vld [vmem:[%s2383_s9 + $0x100] sm:$0xff]  ;;  %v395_v17 = vld [vmem:[%s2383_s9 + $0x110] sm:$0xff]  ;;  %392 = vst [vmem:[%s2391_s10 + $0x78] sm:$0xff] %v391_v15 }
  0x2d   : > { %394 = vst [vmem:[%s2391_s10 + $0x80] sm:$0xff] %v393_v16  ;;  %396 = vst [vmem:[%s2391_s10 + $0x88] sm:$0xff] %v395_v17  ;;  %v397_v18 = vld [vmem:[%s2383_s9 + $0x120] sm:$0xff]  ;;  %v399_v19 = vld [vmem:[%s2383_s9 + $0x130] sm:$0xff] }
  0x2e   : > { %v401_v20 = vld [vmem:[%s2383_s9 + $0x140] sm:$0xff]  ;;  %398 = vst [vmem:[%s2391_s10 + $0x90] sm:$0xff] %v397_v18  ;;  %400 = vst [vmem:[%s2391_s10 + $0x98] sm:$0xff] %v399_v19  ;;  %v403_v21 = vld [vmem:[%s2383_s9 + $0x150] sm:$0xff] }
  0x2f   : > { %402 = vst [vmem:[%s2391_s10 + $0xa0] sm:$0xff] %v401_v20  ;;  %v405_v22 = vld [vmem:[%s2383_s9 + $0x160] sm:$0xff]  ;;  %v407_v23 = vld [vmem:[%s2383_s9 + $0x170] sm:$0xff]  ;;  %404 = vst [vmem:[%s2391_s10 + $0xa8] sm:$0xff] %v403_v21 }
  0x30   : > { %406 = vst [vmem:[%s2391_s10 + $0xb0] sm:$0xff] %v405_v22  ;;  %408 = vst [vmem:[%s2391_s10 + $0xb8] sm:$0xff] %v407_v23  ;;  %v409_v24 = vld [vmem:[%s2383_s9 + $0x180] sm:$0xff]  ;;  %v411_v25 = vld [vmem:[%s2383_s9 + $0x190] sm:$0xff] }
  0x31   : > { %v413_v26 = vld [vmem:[%s2383_s9 + $0x1a0] sm:$0xff]  ;;  %410 = vst [vmem:[%s2391_s10 + $0xc0] sm:$0xff] %v409_v24  ;;  %412 = vst [vmem:[%s2391_s10 + $0xc8] sm:$0xff] %v411_v25  ;;  %v415_v27 = vld [vmem:[%s2383_s9 + $0x1b0] sm:$0xff] }
  0x32   : > { %414 = vst [vmem:[%s2391_s10 + $0xd0] sm:$0xff] %v413_v26  ;;  %v417_v28 = vld [vmem:[%s2383_s9 + $0x1c0] sm:$0xff]  ;;  %v419_v29 = vld [vmem:[%s2383_s9 + $0x1d0] sm:$0xff]  ;;  %416 = vst [vmem:[%s2391_s10 + $0xd8] sm:$0xff] %v415_v27 }
  0x33   : > { %418 = vst [vmem:[%s2391_s10 + $0xe0] sm:$0xff] %v417_v28  ;;  %420 = vst [vmem:[%s2391_s10 + $0xe8] sm:$0xff] %v419_v29  ;;  %v421_v30 = vld [vmem:[%s2383_s9 + $0x1e0] sm:$0xff]  ;;  %v423_v31 = vld [vmem:[%s2383_s9 + $0x1f0] sm:$0xff] }
  0x34   : > { %v425_v32 = vld [vmem:[%s2383_s9 + $0x200] sm:$0xff]  ;;  %422 = vst [vmem:[%s2391_s10 + $0xf0] sm:$0xff] %v421_v30  ;;  %424 = vst [vmem:[%s2391_s10 + $0xf8] sm:$0xff] %v423_v31  ;;  %v427_v33 = vld [vmem:[%s2383_s9 + $0x210] sm:$0xff] }
  0x35   : > { %426 = vst [vmem:[%s2391_s10 + $0x100] sm:$0xff] %v425_v32  ;;  %v429_v34 = vld [vmem:[%s2383_s9 + $0x220] sm:$0xff]  ;;  %v431_v35 = vld [vmem:[%s2383_s9 + $0x230] sm:$0xff]  ;;  %428 = vst [vmem:[%s2391_s10 + $0x108] sm:$0xff] %v427_v33 }
  0x36   : > { %430 = vst [vmem:[%s2391_s10 + $0x110] sm:$0xff] %v429_v34  ;;  %432 = vst [vmem:[%s2391_s10 + $0x118] sm:$0xff] %v431_v35  ;;  %v433_v36 = vld [vmem:[%s2383_s9 + $0x240] sm:$0xff]  ;;  %v435_v37 = vld [vmem:[%s2383_s9 + $0x250] sm:$0xff] }
  0x37   : > { %v437_v38 = vld [vmem:[%s2383_s9 + $0x260] sm:$0xff]  ;;  %434 = vst [vmem:[%s2391_s10 + $0x120] sm:$0xff] %v433_v36  ;;  %436 = vst [vmem:[%s2391_s10 + $0x128] sm:$0xff] %v435_v37  ;;  %v439_v39 = vld [vmem:[%s2383_s9 + $0x270] sm:$0xff] }
  0x38   : > { %438 = vst [vmem:[%s2391_s10 + $0x130] sm:$0xff] %v437_v38  ;;  %v441_v40 = vld [vmem:[%s2383_s9 + $0x280] sm:$0xff]  ;;  %440 = vst [vmem:[%s2391_s10 + $0x138] sm:$0xff] %v439_v39 }
  0x39   : > { %442 = vst [vmem:[%s2391_s10 + $0x140] sm:$0xff] %v441_v40 }
  0x3a PF: > { %p1775_p12 = scmp.ge.s32.totalorder %s2258_s8, 1  ;;  %p457_p13 = scmp.lt.s32.totalorder %s2258_s8, 11 }
  0x3c   : > { %p458_p0 = pnand %p1775_p12, %p457_p13 }
  0x3d   : > { %s2472_s13 = sand.u32 (!%p458_p0), 1, %s2234_s25   ;;  %s501_s16 = smul.u32 (!%p458_p0), 48, %s2242_s27 }
  0x3e   : > { %461 = sbr.rel (%p458_p0) target bundleno = 848 (0x350), region = 82  ;;  %s1776_s19 = sshll.u32 (!%p458_p0), %s2472_s13, 3 }
  0x3f   : > { %s2074_s17 = smul.u32 (!%p458_p0), 328, %s2472_s13  ;;  %p502_p1 = scmp.lt.s32.totalorder (!%p458_p0), %s501_s16, 239 }
  0x40   : > { %s2822_s3 = sld [smem:[#allocation10_spill]] (!%p458_p0)  ;;  %s2482_s10 = scalar_lea.vmem (!%p458_p0), [#allocation4], %s1776_s19 }
  0x41   : > { %s466_s9 = scalar_lea.vmem (!%p458_p0), [#allocation3], %s2074_s17  ;;  %p1779_p2 = scmp.ne.s32.totalorder (!%p458_p0), %s2242_s27, 0 }
  0x45   : > { %s2839_s16 = smov (!%p502_p1, %s501_s16), 239  ;;  %511 = sbr.rel (%p1779_p2) target bundleno = 76 (0x4c), region = 90 }
  0x46   : > { %s1825_s20 = sshll.u32 %s2839_s16, 4  ;;  %v2260_v41 = vmov (!%p1779_p2), 0.0  }
  0x47   : > { %s2480_s23 = scalar_lea.vmem %s2822_s3, %s1825_s20  ;;  %512 = vst [vmem:[#allocation2] sm:$0xff] (!%p1779_p2), %v2260_v41  ;;  %513 = vst [vmem:[#allocation2 + $0x8] sm:$0xff] (!%p1779_p2), %v2260_v41 }
  0x4c PF: > { %v1792_v42 = vld [vmem:[%s2806_s1 + $0x10] sm:$0xff]  ;;  %v1793_v43 = vld [vmem:[%s2806_s1 + $0x18] sm:$0xff]  ;;  %s1826_s20 = sshll.u32 %s2242_s27, 6  ;;  %vm541_vm0 = vcmask 130048   ;;  %v525_v44 = vld [vmem:[%s2806_s1] sm:$0xff]  ;;  %v2261_v31 = vmov 0.0  }
  0x4d   : > { %v1915_v45 = vpack.c.bf16 %v1793_v43, %v1792_v42  ;;  %s516_s21 = scalar_lea.vmem %s466_s9, %s1826_s20 [#allocation3]  ;;  %v526_v46 = vld [vmem:[%s2806_s1 + $0x8] sm:$0xff]  ;;  %v838_v58 = vld [vmem:[%s2480_s23 + $0x78] sm:$0xff]  ;;  %v835_v60 = vld [vmem:[%s2480_s23 + $0x60] sm:$0xff]  ;;  %1163 = vmatprep.mubr.f32.mxu1 %v2261_v31  ;;  %vm847_vm1 = vcmask 392192   ;;  %p1819_p3 = scmp.ne.s32.totalorder %s2242_s27, 4 }
  0x4e   : > { %v1784_v47 = vld [vmem:[%s516_s21 + $0x8] sm:$0xff]  ;;  %v1919_v48 = vpack.c.bf16 %v526_v46, %v525_v44  ;;  %v1785_v49 = vld [vmem:[%s516_s21 + $0x10] sm:$0xff]  ;;  %v1786_v50 = vld [vmem:[%s516_s21 + $0x18] sm:$0xff] }
  0x4f   : > { %1916 = vmatprep.subr.bf16.mxu0 %v1915_v45  ;;  %1887 = vmatprep.mubr.msk.f32.mxu0 %vm541_vm0, %v1784_v47  ;;  %v1787_v51 = vld [vmem:[%s516_s21 + $0x20] sm:$0xff]  ;;  %v1788_v52 = vld [vmem:[%s516_s21 + $0x28] sm:$0xff]  ;;  %v1789_v53 = vld [vmem:[%s516_s21 + $0x30] sm:$0xff] }
  0x50   : > { %1918 = vmatpush3.bf16.msra.mxu0 %v1915_v45  ;;  %v1790_v54 = vld [vmem:[%s516_s21 + $0x38] sm:$0xff]  ;;  %v1791_v55 = vld [vmem:[%s516_s21 + $0x40] sm:$0xff]  ;;  %v836_v57 = vld [vmem:[%s2480_s23 + $0x68] sm:$0xff] }
  0x51   : > { %1920 = vmatprep.subr.bf16.mxu0 %v1919_v48  ;;  %v517_v56 = vld [vmem:[%s516_s21] sm:$0xff]  ;;  %v1923_v59 = vpack.c.bf16 %v838_v58, %v836_v57  ;;  %v837_v61 = vld [vmem:[%s2480_s23 + $0x70] sm:$0xff]  ;;  %v840_v63 = vld [vmem:[%s2480_s23 + $0x88] sm:$0xff] }
  0x52   : > { %v1925_v62 = vpack.c.bf16 %v837_v61, %v835_v60  ;;  %v842_v0 = vld [vmem:[%s2480_s23 + $0x98] sm:$0xff]  ;;  %v1085_v1 = vld [vmem:[%s2480_s23 + $0x128] sm:$0xff]  ;;  %v839_v4 = vld [vmem:[%s2480_s23 + $0x80] sm:$0xff] }
  0x53   : > { %1888 = vmatmul.mubr.msk.f32.vlgmr.msra.gmra.mrb[0].mxu0 %vm541_vm0, %v1785_v49  ;;  %v1927_v2 = vpack.c.bf16 %v842_v0, %v840_v63  ;;  %v1087_v3 = vld [vmem:[%s2480_s23 + $0x138] sm:$0xff]  ;;  %v841_v5 = vld [vmem:[%s2480_s23 + $0x90] sm:$0xff]  ;;  %v1084_v8 = vld [vmem:[%s2480_s23 + $0x120] sm:$0xff] }
  0x54   : > { %1922 = vmatpush3.bf16.msra.mxu0 %v1919_v48  ;;  %1890 = vmatprep.mubr.msk.f32.mxu0 %vm541_vm0, %v1786_v50  ;;  %v1959_v6 = vpack.c.bf16 %v1087_v3, %v1085_v1  ;;  %v1929_v7 = vpack.c.bf16 %v841_v5, %v839_v4  ;;  %v1086_v9 = vld [vmem:[%s2480_s23 + $0x130] sm:$0xff]  ;;  %v844_v11 = vld [vmem:[%s2480_s23 + $0xa8] sm:$0xff]  ;;  %v846_v12 = vld [vmem:[%s2480_s23 + $0xb8] sm:$0xff] }
  0x55   : > { %1924 = vmatprep.subr.bf16.mxu0 %v1923_v59  ;;  %v1961_v10 = vpack.c.bf16 %v1086_v9, %v1084_v8  ;;  %v1089_v13 = vld [vmem:[%s2480_s23 + $0x148] sm:$0xff]  ;;  %v1931_v14 = vpack.c.bf16 %v846_v12, %v844_v11  ;;  %v1091_v15 = vld [vmem:[%s2480_s23 + $0x158] sm:$0xff]  ;;  %v843_v16 = vld [vmem:[%s2480_s23 + $0xa0] sm:$0xff] }
  0x56   : > { %1960 = vmatprep.subr.bf16.mxu1 %v1959_v6  ;;  %v845_v17 = vld [vmem:[%s2480_s23 + $0xb0] sm:$0xff]  ;;  %v1963_v18 = vpack.c.bf16 %v1091_v15, %v1089_v13  ;;  %v1088_v20 = vld [vmem:[%s2480_s23 + $0x140] sm:$0xff]  ;;  %v824_v23 = vld [vmem:[%s2480_s23 + $0x8] sm:$0xff] }
  0x57   : > { %1891 = vmatmul.mubr.msk.f32.gmra.mrb[2].mxu0 %vm541_vm0, %v1787_v51  ;;  %1962 = vmatpush1.bf16.msra.mxu1 %v1961_v10  ;;  %v1933_v19 = vpack.c.bf16 %v845_v17, %v843_v16  ;;  %v1090_v21 = vld [vmem:[%s2480_s23 + $0x150] sm:$0xff]  ;;  %v826_v24 = vld [vmem:[%s2480_s23 + $0x18] sm:$0xff]  ;;  %v1093_v25 = vld [vmem:[%s2480_s23 + $0x168] sm:$0xff] }
  0x58   : > { %1893 = vmatprep.mubr.msk.f32.mxu0 %vm541_vm0, %v1788_v52  ;;  %v1965_v22 = vpack.c.bf16 %v1090_v21, %v1088_v20  ;;  %1964 = vmatprep.subr.bf16.mxu1 %v1963_v18  ;;  %v1935_v26 = vpack.c.bf16 %v826_v24, %v824_v23  ;;  %v1095_v27 = vld [vmem:[%s2480_s23 + $0x178] sm:$0xff]  ;;  %v1092_v29 = vld [vmem:[%s2480_s23 + $0x160] sm:$0xff]  ;;  %v1094_v30 = vld [vmem:[%s2480_s23 + $0x170] sm:$0xff] }
  0x59   : > { %v1967_v28 = vpack.c.bf16 %v1095_v27, %v1093_v25  ;;  %v1969_v32 = vpack.c.bf16 %v1094_v30, %v1092_v29  ;;  %v1173_v33 = vld [vmem:[%s2480_s23 + $0x188] sm:$0xff]  ;;  %v1175_v34 = vld [vmem:[%s2480_s23 + $0x198] sm:$0xff]  ;;  %v2547_v36 = vld [vmem:[%s2807_s2] ss:$0 sm:$0xff] }
  0x5a   : > { %v1971_v35 = vpack.c.bf16 %v1175_v34, %v1173_v33  ;;  %v823_v44 = vld [vmem:[%s2480_s23] sm:$0xff]  ;;  %v825_v45 = vld [vmem:[%s2480_s23 + $0x10] sm:$0xff]  ;;  %v830_v48 = vld [vmem:[%s2480_s23 + $0x38] sm:$0xff] }
  0x5b   : > { %1894 = vmatmul.mubr.msk.f32.gmra.mrb[4].mxu0 %vm541_vm0, %v1789_v53  ;;  %1966 = vmatpush1.bf16.msra.mxu1 %v1965_v22  ;;  %v832_v57 = vld [vmem:[%s2480_s23 + $0x48] sm:$0xff]  ;;  %v834_v60 = vld [vmem:[%s2480_s23 + $0x58] sm:$0xff]  ;;  %v833_v3 = vld [vmem:[%s2480_s23 + $0x50] sm:$0xff] }
  0x5c   : > { %1896 = vmatprep.mubr.msk.f32.mxu0 %vm541_vm0, %v1790_v54  ;;  %1968 = vmatprep.subr.bf16.mxu1 %v1967_v28  ;;  %v1177_v61 = vld [vmem:[%s2480_s23 + $0x1a8] sm:$0xff]  ;;  %v1943_v4 = vpack.c.bf16 %v834_v60, %v832_v57  ;;  %v1176_v6 = vld [vmem:[%s2480_s23 + $0x1a0] sm:$0xff]  ;;  %v999_v10 = vld [vmem:[%s2480_s23 + $0xd8] sm:$0xff] }
  0x5d   : > { %v997_v8 = vld [vmem:[%s2480_s23 + $0xc8] sm:$0xff]  ;;  %v1183_v12 = vld [vmem:[%s2480_s23 + $0x1d8] sm:$0xff]  ;;  %v996_v15 = vld [vmem:[%s2480_s23 + $0xc0] sm:$0xff] }
  0x5e   : > { %v1181_v11 = vld [vmem:[%s2480_s23 + $0x1c8] sm:$0xff]  ;;  %v998_v16 = vld [vmem:[%s2480_s23 + $0xd0] sm:$0xff]  ;;  %v1947_v17 = vpack.c.bf16 %v999_v10, %v997_v8  ;;  %v1003_v22 = vld [vmem:[%s2480_s23 + $0xf8] sm:$0xff] }
  0x5f   : > { %1897 = vmatmul.mubr.msk.f32.gmra.mrb[6].mxu0 %vm541_vm0, %v1791_v55  ;;  %1970 = vmatpush1.bf16.msra.mxu1 %v1969_v32  ;;  %v1172_v55 = vld [vmem:[%s2480_s23 + $0x180] sm:$0xff]  ;;  %v1979_v18 = vpack.c.bf16 %v1183_v12, %v1181_v11  ;;  %v1182_v20 = vld [vmem:[%s2480_s23 + $0x1d0] sm:$0xff]  ;;  %v1001_v21 = vld [vmem:[%s2480_s23 + $0xe8] sm:$0xff] }
  0x60   : > { %1903 = vmatprep.mubr.msk.f32.mxu0 %vm541_vm0, %v517_v56  ;;  %1972 = vmatprep.subr.bf16.mxu1 %v1971_v35  ;;  %v1174_v56 = vld [vmem:[%s2480_s23 + $0x190] sm:$0xff]  ;;  %v1261_v23 = vld [vmem:[%s2480_s23 + $0x1e8] sm:$0xff]  ;;  %v1263_v24 = vld [vmem:[%s2480_s23 + $0x1f8] sm:$0xff]  ;;  %v1951_v30 = vpack.c.bf16 %v1003_v22, %v1001_v21 }
  0x61   : > { %v1973_v1 = vpack.c.bf16 %v1174_v56, %v1172_v55  ;;  %v1000_v28 = vld [vmem:[%s2480_s23 + $0xe0] sm:$0xff]  ;;  %v1002_v29 = vld [vmem:[%s2480_s23 + $0xf0] sm:$0xff]  ;;  %v1983_v32 = vpack.c.bf16 %v1263_v24, %v1261_v23  ;;  %v1005_v35 = vld [vmem:[%s2480_s23 + $0x108] sm:$0xff] }
  0x62   : > { %v1260_v33 = vld [vmem:[%s2480_s23 + $0x1e0] sm:$0xff]  ;;  %v1262_v34 = vld [vmem:[%s2480_s23 + $0x1f0] sm:$0xff]  ;;  %v1349_v60 = vld [vmem:[%s2480_s23 + $0x248] sm:$0xff] }
  0x63   : > { %1904 = vmatmul.mubr.msk.f32.vlgmr.msra.gmra.mrb[0].mxu0 %vm541_vm0, %v1784_v47  ;;  %v828_v47 = vld [vmem:[%s2480_s23 + $0x28] sm:$0xff]  ;;  %v1268_v57 = vld [vmem:[%s2480_s23 + $0x220] sm:$0xff]  ;;  %v1359_v12 = vld [vmem:[%s2480_s23 + $0x298] sm:$0xff] }
  0x64   : > { %1906 = vmatprep.mubr.msk.f32.mxu0 %vm541_vm0, %v1785_v49  ;;  %1926 = vmatpush1.bf16.msra.mxu0 %v1925_v62  ;;  %v1179_v62 = vld [vmem:[%s2480_s23 + $0x1b8] sm:$0xff]  ;;  %v1352_v8 = vld [vmem:[%s2480_s23 + $0x260] sm:$0xff]  ;;  %v1357_v11 = vld [vmem:[%s2480_s23 + $0x288] sm:$0xff] }
  0x65   : > { %1928 = vmatprep.subr.bf16.mxu0 %v1927_v2  ;;  %v831_v2 = vld [vmem:[%s2480_s23 + $0x40] sm:$0xff]  ;;  %v1975_v5 = vpack.c.bf16 %v1179_v62, %v1177_v61  ;;  %v1351_v61 = vld [vmem:[%s2480_s23 + $0x258] sm:$0xff]  ;;  %v1438_v21 = vld [vmem:[%s2480_s23 + $0x2b0] sm:$0xff] }
  0x66   : > { %v1945_v13 = vpack.c.bf16 %v833_v3, %v831_v2  ;;  %v1353_v3 = vld [vmem:[%s2480_s23 + $0x268] sm:$0xff]  ;;  %v1443_v23 = vld [vmem:[%s2480_s23 + $0x2d8] sm:$0xff] }
  0x67   : > { %1907 = vmatmul.mubr.msk.f32.gmra.mrb[2].mxu0 %vm541_vm0, %v1786_v50  ;;  %v1937_v50 = vpack.c.bf16 %v825_v45, %v823_v44  ;;  %v1985_v44 = vpack.c.bf16 %v1262_v34, %v1260_v33  ;;  %v1004_v45 = vld [vmem:[%s2480_s23 + $0x100] sm:$0xff]  ;;  %v1441_v22 = vld [vmem:[%s2480_s23 + $0x2c8] sm:$0xff]  ;;  %v1446_v34 = vld [vmem:[%s2480_s23 + $0x2f0] sm:$0xff] }
  0x68   : > { %1909 = vmatprep.mubr.msk.f32.mxu0 %vm541_vm0, %v1787_v51  ;;  %1930 = vmatpush1.bf16.msra.mxu0 %v1929_v7  ;;  %v827_v51 = vld [vmem:[%s2480_s23 + $0x20] sm:$0xff]  ;;  %v1178_v7 = vld [vmem:[%s2480_s23 + $0x1b0] sm:$0xff] }
  0x69   : > { %1932 = vmatprep.subr.bf16.mxu0 %v1931_v14  ;;  %v1977_v14 = vpack.c.bf16 %v1178_v7, %v1176_v6 }
  0x6b   : > { %1910 = vmatmul.mubr.msk.f32.gmra.mrb[4].mxu0 %vm541_vm0, %v1788_v52  ;;  %v829_v52 = vld [vmem:[%s2480_s23 + $0x30] sm:$0xff] }
  0x6c   : > { %1912 = vmatprep.mubr.msk.f32.mxu0 %vm541_vm0, %v1789_v53  ;;  %1934 = vmatpush1.bf16.msra.mxu0 %v1933_v19  ;;  %v1941_v0 = vpack.c.bf16 %v829_v52, %v827_v51  ;;  %v1180_v19 = vld [vmem:[%s2480_s23 + $0x1c0] sm:$0xff]  ;;  %v1271_v52 = vld [vmem:[%s2480_s23 + $0x238] sm:$0xff] }
  0x6d   : > { %1936 = vmatprep.subr.bf16.mxu0 %v1935_v26  ;;  %v1949_v26 = vpack.c.bf16 %v998_v16, %v996_v15  ;;  %v1981_v27 = vpack.c.bf16 %v1182_v20, %v1180_v19  ;;  %v1358_v15 = vld [vmem:[%s2480_s23 + $0x290] sm:$0xff]  ;;  %v1437_v16 = vld [vmem:[%s2480_s23 + $0x2a8] sm:$0xff]  ;;  %v1436_v20 = vld [vmem:[%s2480_s23 + $0x2a0] sm:$0xff] }
  0x6f   : > { %1913 = vmatmul.mubr.msk.f32.gmra.mrb[6].mxu0 %vm541_vm0, %v1790_v54  ;;  %v1939_v54 = vpack.c.bf16 %v830_v48, %v828_v47  ;;  %v1006_v48 = vld [vmem:[%s2480_s23 + $0x110] sm:$0xff] }
  0x70   : > { %915 = vmatprep.mubr.f32.mxu0 %v2261_v31 }
 0x136   : > { %v1905_v37 = vpop.f32.mrb[0].mxu0 }
 0x137   : > { %v808_v38 = vadd.f32 %v1905_v37, %v2547_v36  ;;  %v761_v39 = vpop.f32.mrb[1].mxu0 }
 0x138   : > { %v807_v49 = vadd.f32 %v2547_v36, %v761_v39  ;;  %v1265_v39 = vld [vmem:[%s2480_s23 + $0x208] sm:$0xff] }
 0x139   : > { %2148 = vtanh.f32 %v808_v38  ;;  %v1007_v38 = vld [vmem:[%s2480_s23 + $0x118] sm:$0xff] }
 0x13a   : > { %v1908_v40 = vpop.f32.mrb[2].mxu0 }
 0x13b   : > { %v810_v41 = vadd.f32 %v1908_v40, %v2547_v36  ;;  %v771_v42 = vpop.f32.mrb[3].mxu0  ;;  %v1267_v40 = vld [vmem:[%s2480_s23 + $0x218] sm:$0xff] }
 0x13c   : > { %v809_v25 = vadd.f32 %v2547_v36, %v771_v42  ;;  %v1953_v42 = vpack.c.bf16 %v1002_v29, %v1000_v28  ;;  %v1987_v47 = vpack.c.bf16 %v1267_v40, %v1265_v39  ;;  %v1442_v28 = vld [vmem:[%s2480_s23 + $0x2d0] sm:$0xff] }
 0x13d   : > { %2150 = vtanh.f32 %v810_v41 }
 0x13e   : > { %v2551_v43 = vpop.f32.mrb[4].mxu0  ;;  %2152 = vtanh.f32 %v807_v49  ;;  %v1264_v49 = vld [vmem:[%s2480_s23 + $0x200] sm:$0xff] }
 0x13f   : > { %v781_v46 = vpop.f32.mrb[5].mxu0  ;;  %v812_v41 = vadd.f32 %v2551_v43, %v2547_v36  ;;  %v1269_v43 = vld [vmem:[%s2480_s23 + $0x228] sm:$0xff] }
 0x140   : > { %v811_v63 = vadd.f32 %v2547_v36, %v781_v46  ;;  %v1955_v46 = vpack.c.bf16 %v1007_v38, %v1005_v35  ;;  %v1991_v56 = vpack.c.bf16 %v1271_v52, %v1269_v43  ;;  %v1553_v52 = vld [vmem:[%s2810_s5 + $0x8] sm:$0xff] (!%p1819_p3) }
 0x142   : > { %v2560_v53 = vpop.f32.mrb[6].mxu0  ;;  %2154 = vtanh.f32 %v811_v63  ;;  %v1995_v63 = vpack.c.bf16 %v1351_v61, %v1349_v60  ;;  %v1555_v60 = vld [vmem:[%s2810_s5 + $0x18] sm:$0xff] (!%p1819_p3)  ;;  %v1572_v61 = vld [vmem:[%s2810_s5 + $0xa0] sm:$0xff] (!%p1819_p3) }
 0x143   : > { %v2149_v58 = vpop.eup %2148  ;;  %v2565_v59 = vpop.f32.mrb[7].mxu0  ;;  %2156 = vtanh.f32 %v809_v25  ;;  %v814_v24 = vadd.f32 %v2560_v53, %v2547_v36  ;;  %v2009_v25 = vpack.c.bf16 %v1438_v21, %v1436_v20  ;;  %v1444_v53 = vld [vmem:[%s2480_s23 + $0x2e0] sm:$0xff]  ;;  %v1579_v20 = vld [vmem:[%s2810_s5 + $0xd8] sm:$0xff] (!%p1819_p3) }
 0x144   : > { %1811 = vmatmul.mubr.msk.f32.vlgmr.msra.gmra.mrb[8].mxu0 %vm847_vm1, %v2149_v58  ;;  %2158 = vtanh.f32 %v812_v41  ;;  %v1270_v58 = vld [vmem:[%s2480_s23 + $0x230] sm:$0xff]  ;;  %v2017_v35 = vpack.c.bf16 %v1446_v34, %v1444_v53  ;;  %v1524_v41 = vld [vmem:[#allocation2] sm:$0xff]  ;;  %v1583_v34 = vld [vmem:[%s2810_s5 + $0xf8] sm:$0xff] (!%p1819_p3) }
 0x145   : > { %1938 = vmatpush1.bf16.msra.mxu0 %v1937_v50  ;;  %989 = vmatprep.mubr.f32.mxu0 %v2261_v31  ;;  %v1266_v50 = vld [vmem:[%s2480_s23 + $0x210] sm:$0xff]  ;;  %v1993_v62 = vpack.c.bf16 %v1270_v58, %v1268_v57 }
 0x146   : > { %1940 = vmatprep.subr.bf16.mxu0 %v1939_v54  ;;  %v1957_v54 = vpack.c.bf16 %v1006_v48, %v1004_v45  ;;  %v1989_v55 = vpack.c.bf16 %v1266_v50, %v1264_v49  ;;  %v1525_v45 = vld [vmem:[#allocation2 + $0x8] sm:$0xff]  ;;  %v1568_v48 = vld [vmem:[%s2810_s5 + $0x80] sm:$0xff] (!%p1819_p3)  ;;  %v1554_v58 = vld [vmem:[%s2810_s5 + $0x10] sm:$0xff] (!%p1819_p3) }
 0x147   : > { %v2151_v9 = vpop.eup %2150  ;;  %v1569_v49 = vld [vmem:[%s2810_s5 + $0x88] sm:$0xff] (!%p1819_p3)  ;;  %v1552_v50 = vld [vmem:[%s2810_s5] sm:$0xff] (!%p1819_p3)  ;;  %v1582_v53 = vld [vmem:[%s2810_s5 + $0xf0] sm:$0xff] (!%p1819_p3) }
 0x148   : > { %1814 = vmatmul.mubr.msk.f32.vlgmr.msra.gmra.mrb[0].mxu1 %vm847_vm1, %v2151_v9  ;;  %v2153_v37 = vpop.eup %2152  ;;  %v1354_v9 = vld [vmem:[%s2480_s23 + $0x270] sm:$0xff]  ;;  %v2019_v43 = vpack.c.bf16 (!%p1819_p3), %v1569_v49, %v1568_v48 }
 0x149   : > { %1942 = vmatpush1.bf16.msra.mxu0 %v1941_v0  ;;  %1974 = vmatpush1.bf16.msra.mxu1 %v1973_v1  ;;  %v1348_v0 = vld [vmem:[%s2480_s23 + $0x240] sm:$0xff]  ;;  %v1350_v1 = vld [vmem:[%s2480_s23 + $0x250] sm:$0xff] }
 0x14a   : > { %1944 = vmatprep.subr.bf16.mxu0 %v1943_v4  ;;  %1976 = vmatprep.subr.bf16.mxu1 %v1975_v5  ;;  %v1355_v4 = vld [vmem:[%s2480_s23 + $0x278] sm:$0xff]  ;;  %v813_v5 = vadd.f32 %v2547_v36, %v2565_v59  ;;  %v1997_v6 = vpack.c.bf16 %v1350_v1, %v1348_v0  ;;  %v2001_v59 = vpack.c.bf16 %v1354_v9, %v1352_v8  ;;  %v1558_v9 = vld [vmem:[%s2810_s5 + $0x30] sm:$0xff] (!%p1819_p3) }
 0x14b   : > { %1251 = vmatprep.mubr.f32.mxu1 %v2261_v31  ;;  %v1999_v7 = vpack.c.bf16 %v1355_v4, %v1353_v3  ;;  %v1557_v3 = vld [vmem:[%s2810_s5 + $0x28] sm:$0xff] (!%p1819_p3)  ;;  %v1574_v4 = vld [vmem:[%s2810_s5 + $0xb0] sm:$0xff] (!%p1819_p3) }
 0x14c   : > { %v2155_v51 = vpop.eup %2154  ;;  %2160 = vtanh.f32 %v813_v5  ;;  %v1575_v5 = vld [vmem:[%s2810_s5 + $0xb8] sm:$0xff] (!%p1819_p3) }
 0x14d   : > { %1946 = vmatpush1.bf16.msra.mxu0 %v1945_v13  ;;  %1978 = vmatpush1.bf16.msra.mxu1 %v1977_v14  ;;  %v2157_v2 = vpop.eup %2156  ;;  %v2003_v13 = vpack.c.bf16 %v1359_v12, %v1357_v11  ;;  %v1356_v14 = vld [vmem:[%s2480_s23 + $0x280] sm:$0xff]  ;;  %2162 = vtanh.f32 %v814_v24  ;;  %v2031_v8 = vpack.c.bf16 (!%p1819_p3), %v1575_v5, %v1574_v4  ;;  %v1577_v12 = vld [vmem:[%s2810_s5 + $0xc8] sm:$0xff] (!%p1819_p3) }
 0x14e   : > { %1948 = vmatprep.subr.bf16.mxu0 %v1947_v17  ;;  %1980 = vmatprep.subr.bf16.mxu1 %v1979_v18  ;;  %v2159_v10 = vpop.eup %2158  ;;  %v1439_v17 = vld [vmem:[%s2480_s23 + $0x2b8] sm:$0xff]  ;;  %v2005_v18 = vpack.c.bf16 %v1358_v15, %v1356_v14  ;;  %v1576_v11 = vld [vmem:[%s2810_s5 + $0xc0] sm:$0xff] (!%p1819_p3) }
 0x14f   : > { %v2007_v19 = vpack.c.bf16 %v1439_v17, %v1437_v16  ;;  %v2035_v16 = vpack.c.bf16 (!%p1819_p3), %v1577_v12, %v1576_v11  ;;  %v1560_v17 = vld [vmem:[%s2810_s5 + $0x40] sm:$0xff] (!%p1819_p3) }
 0x150   : > { %1812 = vmatmul.mubr.msk.f32.vlgmr.msra.gmra.mrb[8].mxu0 %vm847_vm1, %v2153_v37 }
 0x151   : > { %1950 = vmatpush1.bf16.msra.mxu0 %v1949_v26  ;;  %1982 = vmatpush1.bf16.msra.mxu1 %v1981_v27  ;;  %v2011_v26 = vpack.c.bf16 %v1443_v23, %v1441_v22  ;;  %v1440_v27 = vld [vmem:[%s2480_s23 + $0x2c0] sm:$0xff] }
 0x152   : > { %1952 = vmatprep.subr.bf16.mxu0 %v1951_v30  ;;  %1984 = vmatprep.subr.bf16.mxu1 %v1983_v32  ;;  %v1445_v30 = vld [vmem:[%s2480_s23 + $0x2e8] sm:$0xff]  ;;  %v1447_v32 = vld [vmem:[%s2480_s23 + $0x2f8] sm:$0xff]  ;;  %v2013_v33 = vpack.c.bf16 %v1442_v28, %v1440_v27  ;;  %v1580_v27 = vld [vmem:[%s2810_s5 + $0xe0] sm:$0xff] (!%p1819_p3) }
 0x153   : > { %1075 = vmatprep.mubr.f32.mxu0 %v2261_v31  ;;  %v2015_v36 = vpack.c.bf16 %v1447_v32, %v1445_v30  ;;  %v1581_v28 = vld [vmem:[%s2810_s5 + $0xe8] sm:$0xff] (!%p1819_p3) }
 0x154   : > { %1815 = vmatmul.mubr.msk.f32.vlgmr.msra.gmra.mrb[0].mxu1 %vm847_vm1, %v2155_v51  ;;  %v1538_v51 = vlaneseq (!%p1819_p3)  ;;  %v2043_v32 = vpack.c.bf16 (!%p1819_p3), %v1581_v28, %v1580_v27 }
 0x155   : > { %1954 = vmatpush1.bf16.msra.mxu0 %v1953_v42  ;;  %1986 = vmatpush1.bf16.msra.mxu1 %v1985_v44 }
 0x156   : > { %1956 = vmatprep.subr.bf16.mxu0 %v1955_v46  ;;  %1988 = vmatprep.subr.bf16.mxu1 %v1987_v47  ;;  %v2161_v29 = vpop.eup %2160  ;;  %v1539_v0 = vshrl.u32 (!%p1819_p3), %v1538_v51, 7 }
 0x157   : > { %1339 = vmatprep.mubr.f32.mxu1 %v2261_v31  ;;  %v2163_v37 = vpop.eup %2162 }
 0x159   : > { %1958 = vmatpush1.bf16.msra.mxu0 %v1957_v54  ;;  %1990 = vmatpush1.bf16.msra.mxu1 %v1989_v55  ;;  %v1570_v54 = vld [vmem:[%s2810_s5 + $0x90] sm:$0xff] (!%p1819_p3)  ;;  %v1571_v55 = vld [vmem:[%s2810_s5 + $0x98] sm:$0xff] (!%p1819_p3) }
 0x15a   : > { %1992 = vmatprep.subr.bf16.mxu1 %v1991_v56  ;;  %v2021_v56 = vpack.c.bf16 (!%p1819_p3), %v1553_v52, %v1552_v50  ;;  %v2023_v57 = vpack.c.bf16 (!%p1819_p3), %v1571_v55, %v1570_v54  ;;  %2020 = vmatprep.subr.bf16.mxu0 (!%p1819_p3), %v2019_v43 }
 0x15c   : > { %1813 = vmatmul.mubr.msk.f32.vlgmr.msra.gmra.mrb[8].mxu0 %vm847_vm1, %v2157_v2  ;;  %v1556_v2 = vld [vmem:[%s2810_s5 + $0x20] sm:$0xff] (!%p1819_p3) }
 0x15d   : > { %1994 = vmatpush1.bf16.msra.mxu1 %v1993_v62  ;;  %v1573_v62 = vld [vmem:[%s2810_s5 + $0xa8] sm:$0xff] (!%p1819_p3)  ;;  %2022 = vmatpush3.bf16.msra.mxu0 (!%p1819_p3), %v2021_v56 }
 0x15e   : > { %1996 = vmatprep.subr.bf16.mxu1 %v1995_v63  ;;  %v2025_v63 = vpack.c.bf16 (!%p1819_p3), %v1555_v60, %v1554_v58  ;;  %2024 = vmatprep.subr.bf16.mxu0 (!%p1819_p3), %v2023_v57  ;;  %v2027_v1 = vpack.c.bf16 (!%p1819_p3), %v1573_v62, %v1572_v61 }
 0x160   : > { %1816 = vmatmul.mubr.msk.f32.vlgmr.msra.gmra.mrb[0].mxu1 %vm847_vm1, %v2159_v10  ;;  %v1559_v10 = vld [vmem:[%s2810_s5 + $0x38] sm:$0xff] (!%p1819_p3) }
 0x161   : > { %1998 = vmatpush1.bf16.msra.mxu1 %v1997_v6  ;;  %1427 = vmatprep.mubr.f32.mxu1 %v2261_v31  ;;  %v2029_v6 = vpack.c.bf16 (!%p1819_p3), %v1557_v3, %v1556_v2  ;;  %v2033_v14 = vpack.c.bf16 (!%p1819_p3), %v1559_v10, %v1558_v9 }
 0x162   : > { %2000 = vmatprep.subr.bf16.mxu1 %v1999_v7  ;;  %2026 = vmatpush3.bf16.msra.mxu0 (!%p1819_p3), %v2025_v63  ;;  %v1544_v7 = vsub.s32 (!%p1819_p3), 1, %v1539_v0 }
 0x163   : > { %2028 = vmatprep.subr.bf16.mxu0 (!%p1819_p3), %v2027_v1 }
 0x165   : > { %2002 = vmatpush1.bf16.msra.mxu1 %v2001_v59 }
 0x166   : > { %2004 = vmatprep.subr.bf16.mxu1 %v2003_v13  ;;  %v1536_v13 = vld [vmem:[%s2809_s4] sm:$0x3] (!%p1819_p3)  ;;  %2030 = vmatpush3.bf16.msra.mxu0 (!%p1819_p3), %v2029_v6 }
 0x167   : > { %v1545_v15 = vrot.slane (!%p1819_p3), %v1536_v13, %v1544_v7  ;;  %2032 = vmatprep.subr.bf16.mxu0 (!%p1819_p3), %v2031_v8 }
 0x169   : > { %2006 = vmatpush1.bf16.msra.mxu1 %v2005_v18  ;;  %v1561_v18 = vld [vmem:[%s2810_s5 + $0x48] sm:$0xff] (!%p1819_p3) }
 0x16a   : > { %2008 = vmatprep.subr.bf16.mxu1 %v2007_v19  ;;  %v1578_v19 = vld [vmem:[%s2810_s5 + $0xd0] sm:$0xff] (!%p1819_p3)  ;;  %2034 = vmatpush3.bf16.msra.mxu0 (!%p1819_p3), %v2033_v14  ;;  %v2037_v22 = vpack.c.bf16 (!%p1819_p3), %v1561_v18, %v1560_v17 }
 0x16b   : > { %2036 = vmatprep.subr.bf16.mxu0 (!%p1819_p3), %v2035_v16  ;;  %v2039_v24 = vpack.c.bf16 (!%p1819_p3), %v1579_v20, %v1578_v19 }
 0x16c   : > { %1817 = vmatmul.mubr.msk.f32.vlgmr.msra.gmra.mrb[0].mxu1 %vm847_vm1, %v2161_v29  ;;  %v1540_v29 = vsub.s32 (!%p1819_p3), 0, %v1539_v0 }
 0x16d   : > { %2010 = vmatpush1.bf16.msra.mxu1 %v2009_v25  ;;  %1515 = vmatprep.mubr.f32.mxu1 %v2261_v31  ;;  %v1562_v25 = vld [vmem:[%s2810_s5 + $0x50] sm:$0xff] (!%p1819_p3) }
 0x16e   : > { %2012 = vmatprep.subr.bf16.mxu1 %v2011_v26  ;;  %v1563_v26 = vld [vmem:[%s2810_s5 + $0x58] sm:$0xff] (!%p1819_p3)  ;;  %2038 = vmatpush3.bf16.msra.mxu0 (!%p1819_p3), %v2037_v22 }
 0x16f   : > { %v2041_v30 = vpack.c.bf16 (!%p1819_p3), %v1563_v26, %v1562_v25  ;;  %2040 = vmatprep.subr.bf16.mxu0 (!%p1819_p3), %v2039_v24 }
 0x171   : > { %2014 = vmatpush1.bf16.msra.mxu1 %v2013_v33  ;;  %v1564_v33 = vld [vmem:[%s2810_s5 + $0x60] sm:$0xff] (!%p1819_p3) }
 0x172   : > { %2016 = vmatprep.subr.bf16.mxu1 %v2015_v36  ;;  %v1565_v36 = vld [vmem:[%s2810_s5 + $0x68] sm:$0xff] (!%p1819_p3)  ;;  %2042 = vmatpush3.bf16.msra.mxu0 (!%p1819_p3), %v2041_v30 }
 0x173   : > { %2044 = vmatprep.subr.bf16.mxu0 (!%p1819_p3), %v2043_v32 }
 0x175   : > { %2018 = vmatpush1.bf16.msra.mxu1 %v2017_v35  ;;  %v1541_v35 = vrot.slane (!%p1819_p3), %v1536_v13, %v1540_v29 }
 0x178   : > { %1818 = vmatmul.mubr.msk.f32.vlgmr.msra.gmra.mrb[0].mxu1 %vm847_vm1, %v2163_v37  ;;  %v2045_v37 = vpack.c.bf16 (!%p1819_p3), %v1565_v36, %v1564_v33 }
 0x17a   : > { %2046 = vmatpush3.bf16.msra.mxu0 (!%p1819_p3), %v2045_v37 }
 0x22f   : > { %v1077_v38 = vpop.f32.mrb[8].mxu0 }
 0x230   : > { %v1079_v39 = vpop.f32.mrb[9].mxu0 }
 0x24b   : > { %v1517_v40 = vpop.f32.mrb[0].mxu1  ;;  %1533 = sbr.rel (%p1819_p3) target bundleno = 824 (0x338), region = 94 }
 0x24c   : > { %v2051_v42 = vadd.f32 %v1517_v40, %v1077_v38  ;;  %v1519_v44 = vpop.f32.mrb[1].mxu1  ;;  %v1566_v40 = vld [vmem:[%s2810_s5 + $0x70] sm:$0xff] (!%p1819_p3) }
 0x24d   : > { %v2052_v46 = vadd.f32 %v1519_v44, %v1079_v39  ;;  %v2047_v39 = vpack.c.bf16 (!%p1819_p3), %v1583_v34, %v1582_v53 }
 0x24e   : > { %v1526_v31 = vadd.f32 %v2051_v42, %v1524_v41  ;;  %v1567_v41 = vld [vmem:[%s2810_s5 + $0x78] sm:$0xff] (!%p1819_p3) }
 0x24f   : > { %v1527_v47 = vadd.f32 %v2052_v46, %v1525_v45  ;;  %v2049_v44 = vpack.c.bf16 (!%p1819_p3), %v1567_v41, %v1566_v40  ;;  %2048 = vmatprep.subr.bf16.mxu0 (!%p1819_p3), %v2047_v39 }
 0x250   : > { %1528 = vst [vmem:[#allocation2] sm:$0xff] %v1526_v31  ;;  %v1820_v31 = vld [vmem:[%s2811_s6] ss:$0 sm:$0xff] (!%p1819_p3) }
 0x251   : > { %1529 = vst [vmem:[#allocation2 + $0x8] sm:$0xff] %v1527_v47  ;;  %2050 = vmatpush3.bf16.msra.mxu0 (!%p1819_p3), %v2049_v44 }
 0x257   : > { %v1534_v38 = vld [vmem:[#allocation2] sm:$0xff] }
 0x258   : > { %v1535_v59 = vld [vmem:[#allocation2 + $0x8] sm:$0xff]  ;;  %v1548_v42 = vadd.f32 %v1541_v35, %v1534_v38 }
 0x259   : > { %v1549_v21 = vadd.f32 %v1545_v15, %v1535_v59 }
 0x25a   : > { %v1550_v45 = vmax.f32 %v1548_v42, 0.0 }
 0x25b   : > { %v1551_v23 = vmax.f32 %v1549_v21, 0.0 }
 0x25d   : > { %1655 = vmatprep.mubr.f32.mxu0 %v1551_v23 }
 0x25e   : > { %1656 = vmatmul.mubr.f32.vlgmr.msra.gmra.mrb[0].mxu0 %v1550_v45 }
 0x331   : > { %v1880_v46 = vpop.f32.mrb[0].mxu0 }
 0x332   : > { %v1881_v47 = vpop.f32.mrb[1].mxu0 }
 0x333   : > { %v1882_v48 = vadd.f32 %v1881_v47, %v1880_v46 }
 0x335   : > { %v1658_v49 = vadd.f32 %v1882_v48, %v1820_v31 }
 0x337   : > { %1661 = vst [vmem:[%s2482_s10] sm:$0xff] %v1658_v49 }
 0x338 PF: > { %s1822_s9 = sshll.u32 %s2246_s28, 7  ;;  %s1676_s19 = sshll.u32 %s2482_s10, 4  ;;  %s1677_s19 = int_to_ptr.vmem [resolvable:$true] %s1676_s19 }
 0x339   : > { %s2756_s17 = scalar_lea.hbm %s2812_s7, %s1822_s9  ;;  %s1663_s27 = scalar_lea.sflag [#allocation5], %s2472_s13 }
 0x33a   : > { %s2164_s21 = scalar_lea.vmem %s1677_s19, 128  ;;  %s2262_s22 = smov [#allocation4]  }
 0x33b   : > { %p2165_p4 = scmp.ne.s32.totalorder %s1677_s19, %s2164_s21  ;;  %s2168_s0 = sshll.u32 %s2262_s22, 4  ;;  %s2169_s0 = int_to_ptr.vmem [resolvable:$false] %s2168_s0 }
 0x33c   : > { %s2170_s3 = scalar_lea.vmem %s2169_s0, 256  ;;  %p2171_p8 = scmp.lt.s32.totalorder %s1677_s19, %s2169_s0 }
 0x33d   : > { %p2166_p5 = pnand %p2165_p4, %p2359_p7  ;;  %p2172_p10 = scmp.lt.s32.totalorder %s2170_s3, %s2164_s21 }
 0x33f   : > { %p2167_p6 = pneg %p2166_p5  ;;  %p2173_p11 = por %p2172_p10, %p2171_p8 }
 0x341   : > { %p2174_p12 = pnand %p2173_p11, %p2167_p6 }
 0x343   : > { %2177 = shalt.err (!%p2174_p12)
}
 0x344   : > { %s2178_s28 = scalar_lea.hbm %s2756_s17, 128  ;;  %s2182_s11 = scalar_lea.hbm %s2812_s7, 256 }
 0x345   : > { %p2179_p13 = scmp.ne.s32.totalorder %s2756_s17, %s2178_s28  ;;  %p2183_p2 = scmp.lt.u32.totalorder %s2756_s17, %s2812_s7 }
 0x346   : > { %p2184_p3 = scmp.lt.u32.totalorder %s2182_s11, %s2178_s28  ;;  %p2186_p5 = scmp.lt.u32.totalorder %s2178_s28, %s2756_s17 }
 0x347   : > { %p2180_p0 = pnand %p2179_p13, %p2359_p7 }
 0x348   : > { %p2185_p4 = por %p2184_p3, %p2183_p2 }
 0x349   : > { %p2181_p1 = pneg %p2180_p0 }
 0x34a   : > { %p2187_p6 = por %p2186_p5, %p2185_p4 }
 0x34c   : > { %p2188_p8 = pnand %p2187_p6, %p2181_p1 }
 0x34e   : > { %2191 = shalt.err (!%p2188_p8)
}
 0x34f   : > { %2075 = dma.vmem_to_hbm [thread:$0]  (%p2359_p7), %s1677_s19, 128, %s2756_s17, %s1663_s27  }
 0x350 PF: > { %p2081_p10 = scmp.ge.s32.totalorder %s2258_s8, 2  ;;  %s1688_s9 = sand.u32 1, %s2230_s24  }
 0x351   : > { %s1689_s16 = scalar_lea.sflag [#allocation5], %s1688_s9 }
 0x352   : > { %p2078_p11 = pnand %p2081_p10, %p2365_p9 }
 0x354   : > { %2225 = dma.done.wait (!%p2078_p11), %s1689_s16, 128  }
 0x355   : > { %2227 = vsyncadd (!%p2078_p11), %s1689_s16, 4294967168  ;;  %s20_s8 = sadd.s32 1, %s2258_s8   ;;  %s2823_s14 = sld [smem:[#allocation7_spill]] }
 0x356   : > { %p17_p12 = scmp.ge.s32.totalorder %s20_s8, 12   ;;  %s2824_s20 = sld [smem:[#allocation8_spill]] }
 0x357   : > { %s2825_s24 = smov %s2234_s25  ;;  %s2826_s25 = smov %s2238_s26 }
 0x358   : > { %s2827_s26 = smov %s2373_s18  ;;  %s2828_s27 = smov %s2250_s29 }
 0x359   : > { %s2829_s28 = smov %s2254_s30  ;;  %19 = sbr.rel (!%p17_p12) target bundleno = 8 (0x8), region = 140 }
 0x35b   : > { %s2830_s29 = smov %s2823_s14 }
 0x35c   : > { %s2831_s30 = smov %s2824_s20 }
 0x360   :  { %1694 = vsyncpa [#allocation5], 1 }
 0x361   :  { %1696 = vsyncpa [#allocation5 + $0x1], 1 }

</bundles_post_ra>
